<compile_context>
chip_gen: v5e
topology: v5e:2x2
jax: 0.10.0
libtpu: 0.0.40
codegen_flags: <defaults>
</compile_context>

<pallas_src>
import jax
import jax.numpy as jnp
from jax.experimental import pallas as pl
from jax.experimental.pallas import tpu as pltpu


_H1 = 128          # encoder hidden width
_ENC = 64          # latent width
_H2 = 128          # decoder hidden width
_CLS_H = 32        # classifier hidden width
_CLS_HP = 128      # classifier hidden width padded inside the fused matmul
_FUSED_N = _H2 + _CLS_HP   # 256: fused decoder-hidden + classifier-hidden matmul
_CLS_OP = 64       # classifier output padded to 64 lanes (col 0 real)
_PACK = _ENC + _CLS_OP     # 128: lane-dense packed (enc | cls) output width


def _round_up(a, m):
    return ((a + m - 1) // m) * m


def _vmem_capacity_bytes():
    """Physical VMEM of the current generation; conservative fallback = v7x (64 MiB)."""
    try:
        return int(pltpu.get_tpu_info().vmem_capacity_bytes)
    except Exception:
        return 64 * (1 << 20)


def _pick_batch_tile(B, D, requested):
    """Batch tile: multiple of 8, <= requested, generation-aware VMEM budget that
    accounts for the single-buffered weight footprint, and >=2 grid steps when the
    batch allows (so v7x can shard the 'parallel' axis across both TensorCores)."""
    budget = int(_vmem_capacity_bytes() * 0.7)
    # Single-buffered f32 weights: W1 (D,128) + W4 (128,D) + wA/w2/w6/biases (small).
    weight_bytes = 4 * (2 * _H1 * D + _ENC * _FUSED_N + _H1 * _ENC
                        + _CLS_HP * _CLS_OP + 1024)
    avail = max(budget - weight_bytes, 2 * (1 << 20))
    # Per-row f32 bytes: double-buffered x & dec tiles (2*2*D), double-buffered packed
    # output tile (2*128), plus live intermediates (x, h1, enc, h, dec ~ 2*D + ~700).
    per_row = 4 * (6 * D + 960)
    bt = min(requested, max(8, avail // per_row))
    bt = max(8, (bt // 8) * 8)
    bt = min(bt, _round_up(B, 8))
    # Prefer at least 2 grid steps (megacore) when the batch can be split.
    if bt >= B and B > 8:
        bt = max(8, _round_up(pl.cdiv(B, 2), 8))
    return bt


def _combined_kernel(x_ref,
                     w1_ref, b1_ref, w2_ref, b2_ref,      # encoder
                     wA_ref, bA_ref,                      # fused (W3 | W5_padded)
                     w4_ref, b4_ref,                      # decoder output
                     w6_ref, b6_ref,                      # classifier head (padded)
                     dec_ref, pack_ref):
    x = x_ref[...]

    # ---- encoder: relu(relu(x @ W1 + b1) @ W2 + b2) ----
    h1 = jnp.dot(x, w1_ref[...], preferred_element_type=jnp.float32) + b1_ref[...]
    h1 = jnp.maximum(h1, 0.0)
    enc = jnp.dot(h1, w2_ref[...], preferred_element_type=jnp.float32) + b2_ref[...]
    enc = jnp.maximum(enc, 0.0)

    # ---- fused decoder-hidden + classifier-hidden: one (64 -> 256) matmul ----
    h = jnp.dot(enc, wA_ref[...], preferred_element_type=jnp.float32) + bA_ref[...]
    h = jnp.maximum(h, 0.0)
    d1 = h[:, :_H2]    # relu(enc @ W3 + b3)                      (bt, 128)
    c1 = h[:, _H2:]    # relu(enc @ W5 + b5), zero-padded lanes   (bt, 128)

    # ---- decoder output ----
    dec = jnp.dot(d1, w4_ref[...], preferred_element_type=jnp.float32) + b4_ref[...]
    dec = jnp.maximum(dec, 0.0)
    dec_ref[...] = dec.astype(dec_ref.dtype)

    # ---- classifier logits, packed with enc into one lane-dense (bt, 128) output ----
    logits = jnp.dot(c1, w6_ref[...], preferred_element_type=jnp.float32) + b6_ref[...]
    cls = jax.nn.sigmoid(logits)                           # col 0 real, 1..63 unused
    pack_ref[:, :_ENC] = enc.astype(pack_ref.dtype)        # lanes 0..63  = encoded
    pack_ref[:, _ENC:] = cls.astype(pack_ref.dtype)        # lane 64      = cls logit


def pack_params(params):
    """One-time packing of the per-layer (in, out) params into kernel layout.
    Call once at init and reuse — do NOT call per forward."""
    f32 = jnp.float32
    pad_c = _CLS_HP - _CLS_H
    w3, b3, w5, b5 = params["w3"], params["b3"], params["w5"], params["b5"]
    wA = jnp.concatenate([w3, jnp.pad(w5, ((0, 0), (0, pad_c)))], axis=1)   # (64, 256)
    bA = jnp.concatenate([b3, jnp.pad(b5, ((0, 0), (0, pad_c)))], axis=1)   # (1, 256)
    w6p = jnp.zeros((_CLS_HP, _CLS_OP), f32).at[:_CLS_H, :1].set(params["w6"])
    b6p = jnp.zeros((1, _CLS_OP), f32).at[:, :1].set(params["b6"])
    return dict(
        w1=params["w1"].astype(f32), b1=params["b1"].astype(f32),
        w2=params["w2"].astype(f32), b2=params["b2"].astype(f32),
        wA=wA.astype(f32), bA=bA.astype(f32),
        w4=params["w4"].astype(f32), b4=params["b4"].astype(f32),
        w6=w6p, b6=b6p,
    )


def combined_model_forward(x, packed, *, batch_tile=512):
    """Fused CombinedModel forward pass.

    x: (B, D) float32
    packed: output of pack_params()
    Returns (encoded (B, 64), decoded (B, D), cls_out (B, 1)).
    """
    B, D = x.shape
    f32 = jnp.float32

    bt = _pick_batch_tile(B, D, batch_tile)
    grid = (pl.cdiv(B, bt),)   # ragged last block handled by Pallas (masked writes)

    def rep_spec(arr):
        nd = arr.ndim
        # Constant index_map -> same block every step -> single-buffer it.
        return pl.BlockSpec(arr.shape, lambda i, _nd=nd: (0,) * _nd,
                            pipeline_mode=pl.Buffered(1))

    x_spec = pl.BlockSpec((bt, D), lambda i: (i, 0))
    dec_spec = pl.BlockSpec((bt, D), lambda i: (i, 0))
    pack_spec = pl.BlockSpec((bt, _PACK), lambda i: (i, 0))

    out_shape = (
        jax.ShapeDtypeStruct((B, D), f32),
        jax.ShapeDtypeStruct((B, _PACK), f32),
    )

    weight_bytes = sum(int(v.size) * 4 for v in packed.values())
    flops = 2 * B * (D * _H1 + _H1 * _ENC + _ENC * _FUSED_N + _H2 * D
                     + _CLS_HP * _CLS_OP)
    bytes_accessed = 4 * (2 * B * D + B * _PACK) + weight_bytes
    cost = pl.CostEstimate(flops=flops, transcendentals=B * _CLS_OP,
                           bytes_accessed=bytes_accessed)

    vmem_limit = min(int(_vmem_capacity_bytes() * 0.8), 100 * (1 << 20))

    dec, pack = pl.pallas_call(
        _combined_kernel,
        out_shape=out_shape,
        grid_spec=pltpu.PrefetchScalarGridSpec(
            num_scalar_prefetch=0,
            grid=grid,
            in_specs=[
                x_spec,
                rep_spec(packed["w1"]), rep_spec(packed["b1"]),
                rep_spec(packed["w2"]), rep_spec(packed["b2"]),
                rep_spec(packed["wA"]), rep_spec(packed["bA"]),
                rep_spec(packed["w4"]), rep_spec(packed["b4"]),
                rep_spec(packed["w6"]), rep_spec(packed["b6"]),
            ],
            out_specs=[dec_spec, pack_spec],
        ),
        compiler_params=pltpu.CompilerParams(
            dimension_semantics=("parallel",),
            vmem_limit_bytes=vmem_limit,
        ),
        cost_estimate=cost,
    )(x, packed["w1"], packed["b1"], packed["w2"], packed["b2"],
      packed["wA"], packed["bA"], packed["w4"], packed["b4"],
      packed["w6"], packed["b6"])

    enc = pack[:, :_ENC]
    cls = pack[:, _ENC:_ENC + 1]
    return enc, dec, cls


def init_params(input_dimension, key):
    """Deterministic synthetic parameter init (PyTorch-style uniform fan-in)."""
    dims = [
        (input_dimension, 128),  # encoder[0]
        (128, 64),               # encoder[2]
        (64, 128),               # decoder[0]
        (128, input_dimension),  # decoder[2]
        (64, 32),                # classifier[0]
        (32, 1),                 # classifier[2]
    ]
    params = {}
    keys = jax.random.split(key, 2 * len(dims))
    for idx, (fan_in, fan_out) in enumerate(dims):
        bound = 1.0 / jnp.sqrt(fan_in)
        w = jax.random.uniform(keys[2 * idx], (fan_in, fan_out),
                               minval=-bound, maxval=bound, dtype=jnp.float32)
        b = jax.random.uniform(keys[2 * idx + 1], (1, fan_out),
                               minval=-bound, maxval=bound, dtype=jnp.float32)
        params[f"w{idx + 1}"] = w
        params[f"b{idx + 1}"] = b
    return params


def reference_forward(x, p):
    relu = lambda t: jnp.maximum(t, 0.0)
    enc = relu(relu(x @ p["w1"] + p["b1"]) @ p["w2"] + p["b2"])
    dec = relu(relu(enc @ p["w3"] + p["b3"]) @ p["w4"] + p["b4"])
    cls = jax.nn.sigmoid(relu(enc @ p["w5"] + p["b5"]) @ p["w6"] + p["b6"])
    return enc, dec, cls


if __name__ == "__main__":
    key = jax.random.PRNGKey(0)
    k_x, k_p, k_x2 = jax.random.split(key, 3)

    # ---- small-shape check (B=8, D=32) ----
    batch = 8
    input_dimension = 32
    x = jax.random.normal(k_x, (batch, input_dimension), dtype=jnp.float32)
    params = init_params(input_dimension, k_p)
    packed = pack_params(params)   # one-time packing, reused across forward calls

    enc, dec, cls = combined_model_forward(x, packed)
    jax.block_until_ready((enc, dec, cls))

    enc_r, dec_r, cls_r = reference_forward(x, params)
    assert enc.shape == (batch, 64)
    assert dec.shape == (batch, input_dimension)
    assert cls.shape == (batch, 1)
    assert jnp.allclose(enc, enc_r, atol=1e-5, rtol=1e-5)
    assert jnp.allclose(dec, dec_r, atol=1e-5, rtol=1e-5)
    assert jnp.allclose(cls, cls_r, atol=1e-5, rtol=1e-5)

    # ---- ragged / multi-step-grid check (exercises pipelining + masked last block) ----
    B2, D2 = 1000, 96
    x2 = jax.random.normal(k_x2, (B2, D2), dtype=jnp.float32)
    params2 = init_params(D2, jax.random.fold_in(k_p, 1))
    packed2 = pack_params(params2)
    enc2, dec2, cls2 = combined_model_forward(x2, packed2, batch_tile=256)
    jax.block_until_ready((enc2, dec2, cls2))
    enc2_r, dec2_r, cls2_r = reference_forward(x2, params2)
    assert enc2.shape == (B2, 64) and dec2.shape == (B2, D2) and cls2.shape == (B2, 1)
    assert jnp.allclose(enc2, enc2_r, atol=1e-4, rtol=1e-4)
    assert jnp.allclose(dec2, dec2_r, atol=1e-4, rtol=1e-4)
    assert jnp.allclose(cls2, cls2_r, atol=1e-4, rtol=1e-4)

    print("KERNEL_OK")
</pallas_src>

<mosaic_0001>
module attributes {stable_mosaic.version = 11 : i64} {
  func.func @_combined_kernel(%arg0: i32, %arg1: memref<8x32xf32, #tpu.memory_space<vmem>>, %arg2: memref<32x128xf32, #tpu.memory_space<vmem>>, %arg3: memref<1x128xf32, #tpu.memory_space<vmem>>, %arg4: memref<128x64xf32, #tpu.memory_space<vmem>>, %arg5: memref<1x64xf32, #tpu.memory_space<vmem>>, %arg6: memref<64x256xf32, #tpu.memory_space<vmem>>, %arg7: memref<1x256xf32, #tpu.memory_space<vmem>>, %arg8: memref<128x32xf32, #tpu.memory_space<vmem>>, %arg9: memref<1x32xf32, #tpu.memory_space<vmem>>, %arg10: memref<128x64xf32, #tpu.memory_space<vmem>>, %arg11: memref<1x64xf32, #tpu.memory_space<vmem>>, %arg12: memref<8x32xf32, #tpu.memory_space<vmem>>, %arg13: memref<8x128xf32, #tpu.memory_space<vmem>>) attributes {dimension_semantics = [#tpu.dimension_semantics<parallel>], iteration_bounds = array<i64: 1>, scalar_prefetch = 0 : i64, scratch_operands = 0 : i64, tpu.core_type = #tpu.core_type<tc>, window_params = [{transform_indices = @transform_0, window_bounds = array<i64: 8, 32>}, {pipeline_mode = #tpu.pipeline_mode<synchronous>, transform_indices = @transform_1, window_bounds = array<i64: 32, 128>}, {pipeline_mode = #tpu.pipeline_mode<synchronous>, transform_indices = @transform_2, window_bounds = array<i64: 1, 128>}, {pipeline_mode = #tpu.pipeline_mode<synchronous>, transform_indices = @transform_3, window_bounds = array<i64: 128, 64>}, {pipeline_mode = #tpu.pipeline_mode<synchronous>, transform_indices = @transform_4, window_bounds = array<i64: 1, 64>}, {pipeline_mode = #tpu.pipeline_mode<synchronous>, transform_indices = @transform_5, window_bounds = array<i64: 64, 256>}, {pipeline_mode = #tpu.pipeline_mode<synchronous>, transform_indices = @transform_6, window_bounds = array<i64: 1, 256>}, {pipeline_mode = #tpu.pipeline_mode<synchronous>, transform_indices = @transform_7, window_bounds = array<i64: 128, 32>}, {pipeline_mode = #tpu.pipeline_mode<synchronous>, transform_indices = @transform_8, window_bounds = array<i64: 1, 32>}, {pipeline_mode = #tpu.pipeline_mode<synchronous>, transform_indices = @transform_9, window_bounds = array<i64: 128, 64>}, {pipeline_mode = #tpu.pipeline_mode<synchronous>, transform_indices = @transform_10, window_bounds = array<i64: 1, 64>}, {transform_indices = @transform_11, window_bounds = array<i64: 8, 32>}, {transform_indices = @transform_12, window_bounds = array<i64: 8, 128>}]} {
    %c0 = arith.constant 0 : index
    %c0_0 = arith.constant 0 : index
    %0 = vector.load %arg1[%c0, %c0_0] : memref<8x32xf32, #tpu.memory_space<vmem>>, vector<8x32xf32>
    %c0_1 = arith.constant 0 : index
    %c0_2 = arith.constant 0 : index
    %1 = vector.load %arg2[%c0_1, %c0_2] : memref<32x128xf32, #tpu.memory_space<vmem>>, vector<32x128xf32>
    %cst = arith.constant dense<0.000000e+00> : vector<8x128xf32>
    %2 = tpu.matmul %0, %1, %cst {dimension_numbers = #tpu.dot_dimension_numbers<[1], [0], [0], [1], [0, 0, 1, 1], [], []>} : vector<8x32xf32>, vector<32x128xf32>, vector<8x128xf32> -> vector<8x128xf32>
    %c0_3 = arith.constant 0 : index
    %c0_4 = arith.constant 0 : index
    %3 = vector.load %arg3[%c0_3, %c0_4] : memref<1x128xf32, #tpu.memory_space<vmem>>, vector<1x128xf32>
    %4 = vector.broadcast %3 : vector<1x128xf32> to vector<8x128xf32>
    %5 = arith.addf %2, %4 : vector<8x128xf32>
    %cst_5 = arith.constant 0.000000e+00 : f32
    %6 = vector.broadcast %cst_5 : f32 to vector<8x128xf32>
    %7 = arith.maximumf %5, %6 : vector<8x128xf32>
    %c0_6 = arith.constant 0 : index
    %c0_7 = arith.constant 0 : index
    %8 = vector.load %arg4[%c0_6, %c0_7] : memref<128x64xf32, #tpu.memory_space<vmem>>, vector<128x64xf32>
    %cst_8 = arith.constant dense<0.000000e+00> : vector<8x64xf32>
    %9 = tpu.matmul %7, %8, %cst_8 {dimension_numbers = #tpu.dot_dimension_numbers<[1], [0], [0], [1], [0, 0, 1, 1], [], []>} : vector<8x128xf32>, vector<128x64xf32>, vector<8x64xf32> -> vector<8x64xf32>
    %c0_9 = arith.constant 0 : index
    %c0_10 = arith.constant 0 : index
    %10 = vector.load %arg5[%c0_9, %c0_10] : memref<1x64xf32, #tpu.memory_space<vmem>>, vector<1x64xf32>
    %11 = vector.broadcast %10 : vector<1x64xf32> to vector<8x64xf32>
    %12 = arith.addf %9, %11 : vector<8x64xf32>
    %cst_11 = arith.constant 0.000000e+00 : f32
    %13 = vector.broadcast %cst_11 : f32 to vector<8x64xf32>
    %14 = arith.maximumf %12, %13 : vector<8x64xf32>
    %c0_12 = arith.constant 0 : index
    %c0_13 = arith.constant 0 : index
    %15 = vector.load %arg6[%c0_12, %c0_13] : memref<64x256xf32, #tpu.memory_space<vmem>>, vector<64x256xf32>
    %cst_14 = arith.constant dense<0.000000e+00> : vector<8x256xf32>
    %16 = tpu.matmul %14, %15, %cst_14 {dimension_numbers = #tpu.dot_dimension_numbers<[1], [0], [0], [1], [0, 0, 1, 1], [], []>} : vector<8x64xf32>, vector<64x256xf32>, vector<8x256xf32> -> vector<8x256xf32>
    %c0_15 = arith.constant 0 : index
    %c0_16 = arith.constant 0 : index
    %17 = vector.load %arg7[%c0_15, %c0_16] : memref<1x256xf32, #tpu.memory_space<vmem>>, vector<1x256xf32>
    %18 = vector.broadcast %17 : vector<1x256xf32> to vector<8x256xf32>
    %19 = arith.addf %16, %18 : vector<8x256xf32>
    %cst_17 = arith.constant 0.000000e+00 : f32
    %20 = vector.broadcast %cst_17 : f32 to vector<8x256xf32>
    %21 = arith.maximumf %19, %20 : vector<8x256xf32>
    %22 = vector.extract_strided_slice %21 {offsets = [0, 0], sizes = [8, 128], strides = [1, 1]} : vector<8x256xf32> to vector<8x128xf32>
    %23 = vector.extract_strided_slice %21 {offsets = [0, 128], sizes = [8, 128], strides = [1, 1]} : vector<8x256xf32> to vector<8x128xf32>
    %c0_18 = arith.constant 0 : index
    %c0_19 = arith.constant 0 : index
    %24 = vector.load %arg8[%c0_18, %c0_19] : memref<128x32xf32, #tpu.memory_space<vmem>>, vector<128x32xf32>
    %cst_20 = arith.constant dense<0.000000e+00> : vector<8x32xf32>
    %25 = tpu.matmul %22, %24, %cst_20 {dimension_numbers = #tpu.dot_dimension_numbers<[1], [0], [0], [1], [0, 0, 1, 1], [], []>} : vector<8x128xf32>, vector<128x32xf32>, vector<8x32xf32> -> vector<8x32xf32>
    %c0_21 = arith.constant 0 : index
    %c0_22 = arith.constant 0 : index
    %26 = vector.load %arg9[%c0_21, %c0_22] : memref<1x32xf32, #tpu.memory_space<vmem>>, vector<1x32xf32>
    %27 = vector.broadcast %26 : vector<1x32xf32> to vector<8x32xf32>
    %28 = arith.addf %25, %27 : vector<8x32xf32>
    %cst_23 = arith.constant 0.000000e+00 : f32
    %29 = vector.broadcast %cst_23 : f32 to vector<8x32xf32>
    %30 = arith.maximumf %28, %29 : vector<8x32xf32>
    %c0_24 = arith.constant 0 : index
    %c0_25 = arith.constant 0 : index
    %31 = vector.load %arg12[%c0_24, %c0_25] : memref<8x32xf32, #tpu.memory_space<vmem>>, vector<8x32xf32>
    tpu.vector_store %arg12[%c0_24, %c0_25], %30 {strides = array<i32>} : memref<8x32xf32, #tpu.memory_space<vmem>>, vector<8x32xf32>,
    %c0_26 = arith.constant 0 : index
    %c0_27 = arith.constant 0 : index
    %32 = vector.load %arg10[%c0_26, %c0_27] : memref<128x64xf32, #tpu.memory_space<vmem>>, vector<128x64xf32>
    %cst_28 = arith.constant dense<0.000000e+00> : vector<8x64xf32>
    %33 = tpu.matmul %23, %32, %cst_28 {dimension_numbers = #tpu.dot_dimension_numbers<[1], [0], [0], [1], [0, 0, 1, 1], [], []>} : vector<8x128xf32>, vector<128x64xf32>, vector<8x64xf32> -> vector<8x64xf32>
    %c0_29 = arith.constant 0 : index
    %c0_30 = arith.constant 0 : index
    %34 = vector.load %arg11[%c0_29, %c0_30] : memref<1x64xf32, #tpu.memory_space<vmem>>, vector<1x64xf32>
    %35 = vector.broadcast %34 : vector<1x64xf32> to vector<8x64xf32>
    %36 = arith.addf %33, %35 : vector<8x64xf32>
    %37 = arith.negf %36 : vector<8x64xf32>
    %38 = math.exp %37 : vector<8x64xf32>
    %cst_31 = arith.constant 1.000000e+00 : f32
    %39 = vector.broadcast %cst_31 : f32 to vector<8x64xf32>
    %40 = arith.addf %39, %38 : vector<8x64xf32>
    %41 = arith.divf %39, %40 : vector<8x64xf32>
    %c0_32 = arith.constant 0 : index
    %c0_33 = arith.constant 0 : index
    %42 = vector.load %arg13[%c0_32, %c0_33] : memref<8x128xf32, #tpu.memory_space<vmem>>, vector<8x64xf32>
    tpu.vector_store %arg13[%c0_32, %c0_33], %14 {strides = array<i32>} : memref<8x128xf32, #tpu.memory_space<vmem>>, vector<8x64xf32>,
    %c0_34 = arith.constant 0 : index
    %c64 = arith.constant 64 : index
    %43 = vector.load %arg13[%c0_34, %c64] : memref<8x128xf32, #tpu.memory_space<vmem>>, vector<8x64xf32>
    tpu.vector_store %arg13[%c0_34, %c64], %41 {strides = array<i32>} : memref<8x128xf32, #tpu.memory_space<vmem>>, vector<8x64xf32>,
    return
  }
  func.func @transform_0(%arg0: i32) -> (i32, i32) {
    %c0_i32 = arith.constant 0 : i32
    %c0_i32_0 = arith.constant 0 : i32
    return %arg0, %c0_i32 : i32, i32
  }
  func.func @transform_1(%arg0: i32) -> (i32, i32) {
    %c0_i32 = arith.constant 0 : i32
    %c0_i32_0 = arith.constant 0 : i32
    %c0_i32_1 = arith.constant 0 : i32
    return %c0_i32, %c0_i32_0 : i32, i32
  }
  func.func @transform_2(%arg0: i32) -> (i32, i32) {
    %c0_i32 = arith.constant 0 : i32
    %c0_i32_0 = arith.constant 0 : i32
    %c0_i32_1 = arith.constant 0 : i32
    return %c0_i32, %c0_i32_0 : i32, i32
  }
  func.func @transform_3(%arg0: i32) -> (i32, i32) {
    %c0_i32 = arith.constant 0 : i32
    %c0_i32_0 = arith.constant 0 : i32
    %c0_i32_1 = arith.constant 0 : i32
    return %c0_i32, %c0_i32_0 : i32, i32
  }
  func.func @transform_4(%arg0: i32) -> (i32, i32) {
    %c0_i32 = arith.constant 0 : i32
    %c0_i32_0 = arith.constant 0 : i32
    %c0_i32_1 = arith.constant 0 : i32
    return %c0_i32, %c0_i32_0 : i32, i32
  }
  func.func @transform_5(%arg0: i32) -> (i32, i32) {
    %c0_i32 = arith.constant 0 : i32
    %c0_i32_0 = arith.constant 0 : i32
    %c0_i32_1 = arith.constant 0 : i32
    return %c0_i32, %c0_i32_0 : i32, i32
  }
  func.func @transform_6(%arg0: i32) -> (i32, i32) {
    %c0_i32 = arith.constant 0 : i32
    %c0_i32_0 = arith.constant 0 : i32
    %c0_i32_1 = arith.constant 0 : i32
    return %c0_i32, %c0_i32_0 : i32, i32
  }
  func.func @transform_7(%arg0: i32) -> (i32, i32) {
    %c0_i32 = arith.constant 0 : i32
    %c0_i32_0 = arith.constant 0 : i32
    %c0_i32_1 = arith.constant 0 : i32
    return %c0_i32, %c0_i32_0 : i32, i32
  }
  func.func @transform_8(%arg0: i32) -> (i32, i32) {
    %c0_i32 = arith.constant 0 : i32
    %c0_i32_0 = arith.constant 0 : i32
    %c0_i32_1 = arith.constant 0 : i32
    return %c0_i32, %c0_i32_0 : i32, i32
  }
  func.func @transform_9(%arg0: i32) -> (i32, i32) {
    %c0_i32 = arith.constant 0 : i32
    %c0_i32_0 = arith.constant 0 : i32
    %c0_i32_1 = arith.constant 0 : i32
    return %c0_i32, %c0_i32_0 : i32, i32
  }
  func.func @transform_10(%arg0: i32) -> (i32, i32) {
    %c0_i32 = arith.constant 0 : i32
    %c0_i32_0 = arith.constant 0 : i32
    %c0_i32_1 = arith.constant 0 : i32
    return %c0_i32, %c0_i32_0 : i32, i32
  }
  func.func @transform_11(%arg0: i32) -> (i32, i32) {
    %c0_i32 = arith.constant 0 : i32
    %c0_i32_0 = arith.constant 0 : i32
    return %arg0, %c0_i32 : i32, i32
  }
  func.func @transform_12(%arg0: i32) -> (i32, i32) {
    %c0_i32 = arith.constant 0 : i32
    %c0_i32_0 = arith.constant 0 : i32
    return %arg0, %c0_i32 : i32, i32
  }
}

</mosaic_0001>

<bundles_post_ra>
// kernel: tpu_custom_call.1
= control target key start
LH: loop header
LB: loop body
LE: loop exit
PB: predicated region body
PF: predicated region fallthrough
CT: control target
= control target key end

     0   :  { %18 = vsyncpa [#allocation3], 0  ;;  %vm51_vm0 = vcmask 261120   ;;  %s690_s0 = inlined_call_operand.vmem [shape: f32[8,32], index: 0, kind: input, shape index: {}]   ;;  %s691_s1 = inlined_call_operand.vmem [shape: f32[32,128], index: 1, kind: input, shape index: {}]   ;;  %s692_s2 = inlined_call_operand.vmem [shape: f32[1,128], index: 2, kind: input, shape index: {}]   ;;  %s693_s3 = inlined_call_operand.vmem [shape: f32[128,64], index: 3, kind: input, shape index: {}]   ;;  %s694_s4 = inlined_call_operand.vmem [shape: f32[1,64], index: 4, kind: input, shape index: {}]   ;;  %s695_s5 = inlined_call_operand.vmem [shape: f32[64,256], index: 5, kind: input, shape index: {}]   ;;  %s696_s6 = inlined_call_operand.vmem [shape: f32[1,256], index: 6, kind: input, shape index: {}]   ;;  %s697_s7 = inlined_call_operand.vmem [shape: f32[128,32], index: 7, kind: input, shape index: {}]   ;;  %s698_s8 = inlined_call_operand.vmem [shape: f32[1,32], index: 8, kind: input, shape index: {}]   ;;  %s699_s9 = inlined_call_operand.vmem [shape: f32[128,64], index: 9, kind: input, shape index: {}]   ;;  %s700_s10 = inlined_call_operand.vmem [shape: f32[1,64], index: 10, kind: input, shape index: {}]   ;;  %s701_s11 = inlined_call_operand.hbm [shape: f32[8,32], index: 11, kind: output, shape index: {0}]   ;;  %s702_s12 = inlined_call_operand.hbm [shape: f32[8,128], index: 12, kind: output, shape index: {1}]  }
   0x1   :  { %v46_v0 = vld [vmem:[%s691_s1 + $0x18] sm:$0xff]  ;;  %v45_v1 = vld [vmem:[%s691_s1 + $0x10] sm:$0xff]  ;;  %v44_v3 = vld [vmem:[%s691_s1 + $0x8] sm:$0xff] }
   0x2   :  { %67 = vmatpush.msra.mxu0 %v46_v0  ;;  %v91_v2 = vld [vmem:[%s693_s3 + $0x78] sm:$0xff]  ;;  %v90_v4 = vld [vmem:[%s693_s3 + $0x70] sm:$0xff]  ;;  %v89_v5 = vld [vmem:[%s693_s3 + $0x68] sm:$0xff] }
   0x3   :  { %96 = vmatpush.msra.mxu1 %v91_v2  ;;  %v43_v6 = vld [vmem:[%s691_s1] sm:$0xff]  ;;  %v87_v9 = vld [vmem:[%s693_s3 + $0x58] sm:$0xff] }
   0x4   :  { %68 = vmatpush.msra.mxu0 %v45_v1  ;;  %v42_v7 = vld [vmem:[%s690_s0] sm:$0xff] }
   0x5   :  { %97 = vmatpush.msra.mxu1 %v90_v4  ;;  %v88_v8 = vld [vmem:[%s693_s3 + $0x60] sm:$0xff] }
   0x6   :  { %69 = vmatpush.msra.mxu0 %v44_v3 }
   0x7   :  { %98 = vmatpush.msra.mxu1 %v89_v5 }
   0x8   :  { %70 = vmatpush.msra.mxu0 %v43_v6 }
   0x9   :  { %19 = vsyncpa [#allocation5], 0  ;;  %325 = vmatmul.msk.f32.vlgmr.msra.gmra.mxu0 %vm51_vm0, %v42_v7  ;;  %99 = vmatpush.msra.mxu1 %v88_v8  ;;  %v86_v10 = vld [vmem:[%s693_s3 + $0x50] sm:$0xff]  ;;  %v85_v11 = vld [vmem:[%s693_s3 + $0x48] sm:$0xff]  ;;  %vm139_vm1 = vcmask 523264   ;;  %s392_s14 = smov [#allocation2]  }
   0xa   :  { %v84_v12 = vld [vmem:[%s693_s3 + $0x40] sm:$0xff]  ;;  %v83_v13 = vld [vmem:[%s693_s3 + $0x38] sm:$0xff]  ;;  %v82_v14 = vld [vmem:[%s693_s3 + $0x30] sm:$0xff]  ;;  %s298_s15 = sshll.u32 %s392_s14, 4  ;;  %s300_s17 = sshll.u32 %s701_s11, 4  ;;  %vm291_vm6 = vcmask 1048064   ;;  %s299_s15 = int_to_ptr.vmem [resolvable:$true] %s298_s15  ;;  %s301_s17 = int_to_ptr.hbm [resolvable:$true] %s300_s17 }
   0xb   :  { %100 = vmatpush.msra.mxu1 %v87_v9  ;;  %v81_v15 = vld [vmem:[%s693_s3 + $0x28] sm:$0xff]  ;;  %v80_v16 = vld [vmem:[%s693_s3 + $0x20] sm:$0xff]  ;;  %v79_v17 = vld [vmem:[%s693_s3 + $0x18] sm:$0xff]  ;;  %s394_s11 = smov [#allocation4]   ;;  %s311_s21 = sshll.u32 %s702_s12, 4  ;;  %s312_s21 = int_to_ptr.hbm [resolvable:$true] %s311_s21 }
   0xc   :  { %v78_v18 = vld [vmem:[%s693_s3 + $0x10] sm:$0xff]  ;;  %v77_v19 = vld [vmem:[%s693_s3 + $0x8] sm:$0xff]  ;;  %v76_v20 = vld [vmem:[%s693_s3] sm:$0xff]  ;;  %s309_s18 = sshll.u32 %s394_s11, 4  ;;  %s310_s18 = int_to_ptr.vmem [resolvable:$true] %s309_s18 }
   0xd   :  { %101 = vmatpush.msra.mxu1 %v86_v10  ;;  %v131_v21 = vld [vmem:[%s695_s5 + $0x70] sm:$0xff]  ;;  %v129_v22 = vld [vmem:[%s695_s5 + $0x60] sm:$0xff]  ;;  %v132_v29 = vld [vmem:[%s695_s5 + $0x78] sm:$0xff] }
   0xe   :  { %151 = vmatpush.msra.mxu3 %v131_v21  ;;  %v127_v23 = vld [vmem:[%s695_s5 + $0x50] sm:$0xff]  ;;  %v125_v24 = vld [vmem:[%s695_s5 + $0x40] sm:$0xff]  ;;  %v130_v34 = vld [vmem:[%s695_s5 + $0x68] sm:$0xff] }
   0xf   :  { %102 = vmatpush.msra.mxu1 %v85_v11  ;;  %v123_v25 = vld [vmem:[%s695_s5 + $0x30] sm:$0xff]  ;;  %v121_v26 = vld [vmem:[%s695_s5 + $0x20] sm:$0xff]  ;;  %v128_v35 = vld [vmem:[%s695_s5 + $0x58] sm:$0xff] }
  0x10   :  { %152 = vmatpush.msra.mxu3 %v129_v22  ;;  %v119_v27 = vld [vmem:[%s695_s5 + $0x10] sm:$0xff]  ;;  %v117_v28 = vld [vmem:[%s695_s5] sm:$0xff]  ;;  %v126_v36 = vld [vmem:[%s695_s5 + $0x48] sm:$0xff] }
  0x11   :  { %103 = vmatpush.msra.mxu1 %v84_v12  ;;  %v332_v30 = vld [vmem:[%s692_s2] ss:$0 sm:$0xff]  ;;  %v124_v37 = vld [vmem:[%s695_s5 + $0x38] sm:$0xff]  ;;  %v122_v38 = vld [vmem:[%s695_s5 + $0x28] sm:$0xff] }
  0x12   :  { %153 = vmatpush.msra.mxu3 %v127_v23  ;;  %v120_v39 = vld [vmem:[%s695_s5 + $0x18] sm:$0xff]  ;;  %v118_v40 = vld [vmem:[%s695_s5 + $0x8] sm:$0xff]  ;;  %v199_v42 = vld [vmem:[%s697_s7 + $0x70] sm:$0xff] }
  0x13   :  { %104 = vmatpush.msra.mxu1 %v83_v13  ;;  %v200_v41 = vld [vmem:[%s697_s7 + $0x78] sm:$0xff]  ;;  %v198_v44 = vld [vmem:[%s697_s7 + $0x68] sm:$0xff]  ;;  %v241_v45 = vld [vmem:[%s699_s9 + $0x70] sm:$0xff] }
  0x14   :  { %154 = vmatpush.msra.mxu3 %v125_v24  ;;  %205 = vmatpush.msrb.mxu0 %v200_v41  ;;  %v242_v43 = vld [vmem:[%s699_s9 + $0x78] sm:$0xff]  ;;  %v240_v46 = vld [vmem:[%s699_s9 + $0x68] sm:$0xff]  ;;  %v197_v47 = vld [vmem:[%s697_s7 + $0x60] sm:$0xff] }
  0x15   :  { %105 = vmatpush.msra.mxu1 %v82_v14  ;;  %247 = vmatpush.msra.mxu2 %v242_v43  ;;  %v239_v48 = vld [vmem:[%s699_s9 + $0x60] sm:$0xff]  ;;  %v196_v49 = vld [vmem:[%s697_s7 + $0x58] sm:$0xff]  ;;  %v195_v51 = vld [vmem:[%s697_s7 + $0x50] sm:$0xff] }
  0x16   :  { %155 = vmatpush.msra.mxu3 %v123_v25  ;;  %206 = vmatpush.msrb.mxu0 %v199_v42  ;;  %v238_v50 = vld [vmem:[%s699_s9 + $0x58] sm:$0xff]  ;;  %v237_v52 = vld [vmem:[%s699_s9 + $0x50] sm:$0xff]  ;;  %v194_v53 = vld [vmem:[%s697_s7 + $0x48] sm:$0xff] }
  0x17   :  { %106 = vmatpush.msra.mxu1 %v81_v15  ;;  %248 = vmatpush.msra.mxu2 %v241_v45  ;;  %v236_v54 = vld [vmem:[%s699_s9 + $0x48] sm:$0xff]  ;;  %v193_v55 = vld [vmem:[%s697_s7 + $0x40] sm:$0xff]  ;;  %v192_v57 = vld [vmem:[%s697_s7 + $0x38] sm:$0xff] }
  0x18   :  { %156 = vmatpush.msra.mxu3 %v121_v26  ;;  %207 = vmatpush.msrb.mxu0 %v198_v44  ;;  %v235_v56 = vld [vmem:[%s699_s9 + $0x40] sm:$0xff]  ;;  %v234_v58 = vld [vmem:[%s699_s9 + $0x38] sm:$0xff]  ;;  %v191_v60 = vld [vmem:[%s697_s7 + $0x30] sm:$0xff] }
  0x19   :  { %107 = vmatpush.msra.mxu1 %v80_v16  ;;  %249 = vmatpush.msra.mxu2 %v240_v46  ;;  %v333_v59 = vld [vmem:[%s694_s4] ss:$0 sm:$0xff]  ;;  %v190_v61 = vld [vmem:[%s697_s7 + $0x28] sm:$0xff]  ;;  %v188_v2 = vld [vmem:[%s697_s7 + $0x18] sm:$0xff] }
  0x1a   :  { %157 = vmatpush.msra.mxu3 %v119_v27  ;;  %208 = vmatpush.msrb.mxu0 %v197_v47  ;;  %v189_v0 = vld [vmem:[%s697_s7 + $0x20] sm:$0xff]  ;;  %v187_v3 = vld [vmem:[%s697_s7 + $0x10] sm:$0xff]  ;;  %v186_v5 = vld [vmem:[%s697_s7 + $0x8] sm:$0xff] }
  0x1b   :  { %108 = vmatpush.msra.mxu1 %v79_v17  ;;  %250 = vmatpush.msra.mxu2 %v239_v48  ;;  %v233_v4 = vld [vmem:[%s699_s9 + $0x30] sm:$0xff]  ;;  %v232_v6 = vld [vmem:[%s699_s9 + $0x28] sm:$0xff]  ;;  %v185_v7 = vld [vmem:[%s697_s7] sm:$0xff] }
  0x1c   :  { %158 = vmatpush.msra.mxu3 %v117_v28  ;;  %209 = vmatpush.msrb.mxu0 %v196_v49  ;;  %v231_v8 = vld [vmem:[%s699_s9 + $0x20] sm:$0xff]  ;;  %v230_v9 = vld [vmem:[%s699_s9 + $0x18] sm:$0xff]  ;;  %v229_v10 = vld [vmem:[%s699_s9 + $0x10] sm:$0xff] }
  0x1d   :  { %109 = vmatpush.msra.mxu1 %v78_v18  ;;  %251 = vmatpush.msra.mxu2 %v238_v50  ;;  %v228_v11 = vld [vmem:[%s699_s9 + $0x8] sm:$0xff]  ;;  %v227_v12 = vld [vmem:[%s699_s9] sm:$0xff] }
  0x1e   :  { %171 = vmatpush.msrb.mxu3 %v132_v29  ;;  %210 = vmatpush.msrb.mxu0 %v195_v51  ;;  %v133_v13 = vld [vmem:[%s696_s6] sm:$0x3] }
  0x1f   :  { %110 = vmatpush.msra.mxu1 %v77_v19  ;;  %252 = vmatpush.msra.mxu2 %v237_v52  ;;  %v135_v14 = vperm.slane %v133_v13, 0  ;;  %v136_v18 = vperm.slane %v133_v13, 1  ;;  %v334_v22 = vld [vmem:[%s698_s8] ss:$0 sm:$0xff] }
  0x20   :  { %172 = vmatpush.msrb.mxu3 %v130_v34  ;;  %211 = vmatpush.msrb.mxu0 %v194_v53  ;;  %v335_v26 = vld [vmem:[%s700_s10] ss:$0 sm:$0xff]  ;;  %s393_s10 = smov 64  }
  0x21   :  { %111 = vmatpush.msra.mxu1 %v76_v20  ;;  %253 = vmatpush.msra.mxu2 %v236_v54 }
  0x22   :  { %173 = vmatpush.msrb.mxu3 %v128_v35  ;;  %212 = vmatpush.msrb.mxu0 %v193_v55 }
  0x23   :  { %254 = vmatpush.msra.mxu2 %v235_v56 }
  0x24   :  { %174 = vmatpush.msrb.mxu3 %v126_v36  ;;  %213 = vmatpush.msrb.mxu0 %v192_v57 }
  0x25   :  { %255 = vmatpush.msra.mxu2 %v234_v58 }
  0x26   :  { %175 = vmatpush.msrb.mxu3 %v124_v37  ;;  %214 = vmatpush.msrb.mxu0 %v191_v60 }
  0x27   :  { %256 = vmatpush.msra.mxu2 %v233_v4 }
  0x28   :  { %176 = vmatpush.msrb.mxu3 %v122_v38  ;;  %215 = vmatpush.msrb.mxu0 %v190_v61 }
  0x29   :  { %257 = vmatpush.msra.mxu2 %v232_v6 }
  0x2a   :  { %177 = vmatpush.msrb.mxu3 %v120_v39  ;;  %216 = vmatpush.msrb.mxu0 %v189_v0 }
  0x2b   :  { %258 = vmatpush.msra.mxu2 %v231_v8 }
  0x2c   :  { %178 = vmatpush.msrb.mxu3 %v118_v40  ;;  %217 = vmatpush.msrb.mxu0 %v188_v2 }
  0x2d   :  { %259 = vmatpush.msra.mxu2 %v230_v9 }
  0x2e   :  { %218 = vmatpush.msrb.mxu0 %v187_v3 }
  0x2f   :  { %260 = vmatpush.msra.mxu2 %v229_v10 }
  0x30   :  { %219 = vmatpush.msrb.mxu0 %v186_v5 }
  0x31   :  { %261 = vmatpush.msra.mxu2 %v228_v11 }
  0x32   :  { %220 = vmatpush.msrb.mxu0 %v185_v7 }
  0x33   :  { %262 = vmatpush.msra.mxu2 %v227_v12 }
  0x86   :  { %v72_v31 = vpop.f32.mrf.mxu0 }
  0x87   :  { %v73_v32 = vadd.f32 %v332_v30, %v72_v31 }
  0x89   :  { %v75_v33 = vmax.f32 %v73_v32, 0.0 }
  0x8b   :  { %112 = vmatmul.f32.vlgmr.msra.gmra.mxu1 %v75_v33 }
 0x108   :  { %v113_v62 = vpop.f32.mrf.mxu1 }
 0x109   :  { %v114_v63 = vadd.f32 %v333_v59, %v113_v62 }
 0x10b   :  { %v116_v1 = vmax.f32 %v114_v63, 0.0 }
 0x10d   :  { %326 = vmatmul.msk.f32.vlgmr.msra.gmra.mxu3 %vm139_vm1, %v116_v1  ;;  %286 = vst.msk [vmem:[#allocation4] sm:$0xff] %vm139_vm1, %v116_v1 }
 0x115   :  { %327 = vmatmul.msk.f32.vlgmr.msrb.gmra.mxu3 %vm139_vm1, %v116_v1 }
 0x190   :  { %v160_v15 = vpop.f32.mrf.mxu3 }
 0x191   :  { %v161_v16 = vadd.f32 %v160_v15, %v135_v14 }
 0x193   :  { %v183_v17 = vmax.f32 %v161_v16, 0.0 }
 0x195   :  { %221 = vmatmul.f32.vlgmr.msrb.gmra.mxu0 %v183_v17 }
 0x198   :  { %v180_v19 = vpop.f32.mrf.mxu3 }
 0x199   :  { %v181_v20 = vadd.f32 %v180_v19, %v136_v18 }
 0x19b   :  { %v184_v21 = vmax.f32 %v181_v20, 0.0 }
 0x19d   :  { %263 = vmatmul.f32.vlgmr.msra.gmra.mxu2 %v184_v21 }
 0x212   :  { %v222_v23 = vpop.f32.mrf.mxu0 }
 0x213   :  { %v223_v24 = vadd.f32 %v334_v22, %v222_v23 }
 0x215   :  { %v225_v25 = vmax.f32 %v223_v24, 0.0 }
 0x217   :  { %226 = vst.msk [vmem:[#allocation2] sm:$0xff] %vm51_vm0, %v225_v25 }
 0x218   :  { %303 = dma.vmem_to_hbm [thread:$0]  %s299_s15, 128, %s301_s17, [#allocation3]  }
 0x220   :  { %v264_v27 = vpop.f32.mrf.mxu2 }
 0x221   :  { %v265_v28 = vadd.f32 %v335_v26, %v264_v27 }
 0x223   :  { %v328_v29 = vmul.f32 -1.442695, %v265_v28 }
 0x225   :  { %336 = vpow2.f32 %v328_v29 }
 0x22b   :  { %v337_v30 = vpop.eup %336 }
 0x22c   :  { %v270_v31 = vadd.f32 1.0, %v337_v30 }
 0x22e   :  { %338 = vrcp.f32 %v270_v31  ;;  %v282_v35 = vand.u32 2147483648, %v270_v31  ;;  %v280_v37 = vand.u32 2147483647, %v270_v31  ;;  %vm276_vm3 = vweird.f32 %v270_v31 }
 0x230   :  { %v283_v39 = vor.u32 1.1754944e-38, %v282_v35  ;;  %vm281_vm5 = vcmp.eq.f32.partialorder %v280_v37, 8.507059e+37 }
 0x234   :  { %v339_v32 = vpop.eup %338 }
 0x235   :  { %v272_v33 = vmul.f32 %v339_v32, %v270_v31  ;;  %vm277_vm2 = vweird.f32 %v339_v32 }
 0x236   :  { %vm278_vm4 = vmor %vm276_vm3, %vm277_vm2 }
 0x237   :  { %v273_v34 = vsub.f32 1.0, %v272_v33 }
 0x239   :  { %v274_v36 = vmul.f32 %v339_v32, %v273_v34 }
 0x23b   :  { %v275_v38 = vadd.f32 %v339_v32, %v274_v36 }
 0x23d   :  { %v279_v40 = vsel %vm278_vm4, %v339_v32, %v275_v38 }
 0x23e   :  { %v284_v41 = vsel %vm281_vm5, %v283_v39, %v279_v40 }
 0x23f   :  { %288 = vrot.lane.b32.xlu0 %v284_v41, %s393_s10 }
 0x2b1   :  { %v289_v42 = vpop.permute.xlu0 %288 }
 0x2b2   :  { %292 = vst.msk [vmem:[#allocation4] sm:$0xff] %vm291_vm6, %v289_v42 }
 0x2b3   :  { %314 = dma.vmem_to_hbm [thread:$0]  %s310_s18, 128, %s312_s21, [#allocation5]  }
 0x2b4   :  { %388 = dma.done.wait [#allocation3], 128  }
 0x2b5   :  { %389 = vsyncadd [#allocation3], 4294967168 }
 0x2b6   :  { %390 = dma.done.wait [#allocation5], 128  }
 0x2b7   :  { %391 = vsyncadd [#allocation5], 4294967168 }
 0x2b8   :  { %323 = vsyncpa [#allocation3], 1 }
 0x2b9   :  { %324 = vsyncpa [#allocation5], 1 }

</bundles_post_ra>
